<compile_context>
chip_gen: v7x
topology: tpu7x:2x2x1
jax: 0.10.0
libtpu: 0.0.40
codegen_flags: <defaults>
</compile_context>

<pallas_src>
import jax
import jax.numpy as jnp
import numpy as np
from jax.experimental import pallas as pl
from jax.experimental.pallas import tpu as pltpu


def _word_window_kernel(emb_ref, w1_ref, b1_ref, w2_ref, b2_ref, o_ref):
    # emb_ref: (1, L, D)   bf16  un-windowed embeddings for one sentence
    # w1_ref : (W, D, Hp)  bf16  hidden weights, one (D, Hp) slab per offset
    # b1_ref : (1, Hp)     f32
    # w2_ref : (1, Hp)     f32   output weights as a row (zero-padded)
    # b2_ref : (1, 1)      f32
    # o_ref  : (1, Lp, 1)  f32   sigmoid probabilities for this sentence
    W = w1_ref.shape[0]
    Lp = o_ref.shape[1]
    Hp = b1_ref.shape[1]

    # Layer 1: h[t, :] = tanh( sum_w emb[t + w, :] @ W1[w] + b1 )
    # (shifted matmuls -- the windowed slab is never built)
    acc = jnp.zeros((Lp, Hp), jnp.float32)
    for w in range(W):                               # static, W is small
        xw = emb_ref[0, pl.ds(w, Lp), :]             # (Lp, D) bf16
        acc = acc + jnp.dot(xw, w1_ref[w],
                            preferred_element_type=jnp.float32)
    h = jnp.tanh(acc + b1_ref[...])                  # (Lp, Hp) f32

    # Layer 2 (out_features == 1): VPU multiply + lane reduce, not an N=1
    # MXU matmul.  Padded lanes contribute 0 (w2 padding is zero).
    z = jnp.sum(h * w2_ref[...], axis=-1, keepdims=True) + b2_ref[...]
    o_ref[0] = jax.nn.sigmoid(z)                     # (Lp, 1)


def word_window_forward(emb_seq, w1, b1, w2, b2, adjusted_length):
    """emb_seq: (B, L, D) bf16; w1: (W, D, Hp) bf16; b1/w2: (1, Hp) f32; b2: (1, 1) f32."""
    B, L, D = emb_seq.shape
    W, _, Hp = w1.shape
    Lp = adjusted_length

    out = pl.pallas_call(
        _word_window_kernel,
        out_shape=jax.ShapeDtypeStruct((B, Lp, 1), jnp.float32),
        grid=(B,),
        in_specs=[
            pl.BlockSpec((1, L, D), lambda b: (b, 0, 0)),    # per-sentence tile
            pl.BlockSpec((W, D, Hp), lambda b: (0, 0, 0)),   # VMEM-resident weights
            pl.BlockSpec((1, Hp), lambda b: (0, 0)),
            pl.BlockSpec((1, Hp), lambda b: (0, 0)),
            pl.BlockSpec((1, 1), lambda b: (0, 0)),
        ],
        out_specs=pl.BlockSpec((1, Lp, 1), lambda b: (b, 0, 0)),
        compiler_params=pltpu.CompilerParams(
            dimension_semantics=("parallel",),       # megacore sharding on v7x
            vmem_limit_bytes=32 * 1024 * 1024,       # explicit; safe on 64 MiB v7x
        ),
    )(emb_seq, w1, b1, w2, b2)
    return out.reshape(B, Lp)


class WordWindowClassifierPallas:
    def __init__(self, hyperparameters, vocab_size, pad_ix=0, *, key):
        self.window_size = hyperparameters["window_size"]
        self.embed_dim = hyperparameters["embed_dim"]
        self.hidden_dim = hyperparameters["hidden_dim"]
        self.freeze_embeddings = hyperparameters["freeze_embeddings"]

        W = 2 * self.window_size + 1
        D = self.embed_dim
        H = self.hidden_dim
        Hp = ((H + 127) // 128) * 128                # pad hidden dim to full lanes
        self.full_window = W
        self.hidden_pad = Hp

        k_emb, k_w1, k_b1, k_w2, k_b2 = jax.random.split(key, 5)
        emb = jax.random.normal(k_emb, (vocab_size, D), jnp.float32)
        emb = emb.at[pad_ix].set(0.0)                # nn.Embedding padding_idx row
        self.emb = emb.astype(jnp.bfloat16)          # bf16 MXU input stream

        K = W * D
        lim1 = 1.0 / np.sqrt(K)
        w1 = jax.random.uniform(k_w1, (W, D, H), jnp.float32, -lim1, lim1)
        b1 = jax.random.uniform(k_b1, (1, H), jnp.float32, -lim1, lim1)
        lim2 = 1.0 / np.sqrt(H)
        w2 = jax.random.uniform(k_w2, (1, H), jnp.float32, -lim2, lim2)
        b2 = jax.random.uniform(k_b2, (1, 1), jnp.float32, -lim2, lim2)

        # Zero-pad hidden dim to Hp lanes; padded lanes are inert
        # (w1/b1 pad = 0 -> tanh(0) = 0, and w2 pad = 0).
        self.w1 = jnp.pad(w1, ((0, 0), (0, 0), (0, Hp - H))).astype(jnp.bfloat16)
        self.b1 = jnp.pad(b1, ((0, 0), (0, Hp - H)))
        self.w2 = jnp.pad(w2, ((0, 0), (0, Hp - H)))
        self.b2 = b2

    def __call__(self, inputs):
        """inputs: (B, L) int32 token indices -> (B, L~) f32 probabilities."""
        B, L = inputs.shape
        W = self.full_window
        Lp = L - W + 1
        # Single embedding gather, NO windowed duplication (the kernel applies
        # the W shifted matmuls itself).
        emb_seq = jnp.take(self.emb, inputs, axis=0)         # (B, L, D) bf16
        return word_window_forward(emb_seq, self.w1, self.b1, self.w2,
                                   self.b2, Lp)


def _reference_forward(model, inputs):
    """Pure-JAX reference in the original windowed (unfold) formulation."""
    B, L = inputs.shape
    W = model.full_window
    Lp = L - W + 1
    emb = jnp.take(model.emb, inputs, axis=0).astype(jnp.float32)     # (B, L, D)
    # Window stack only in the validation path (toy sizes).
    x = jnp.stack([emb[:, i:i + W, :] for i in range(Lp)], axis=1)    # (B, Lp, W, D)
    w1 = model.w1.astype(jnp.float32)                                 # (W, D, Hp)
    h = jnp.tanh(jnp.einsum("blwd,wdh->blh", x, w1) + model.b1[0])
    z = jnp.sum(h * model.w2[0], axis=-1) + model.b2[0, 0]
    return jax.nn.sigmoid(z)                                          # (B, Lp)


if __name__ == "__main__":
    key = jax.random.PRNGKey(0)
    k_param, k_in = jax.random.split(key)

    hyperparameters = {
        "window_size": 2,
        "embed_dim": 32,
        "hidden_dim": 32,
        "freeze_embeddings": False,
    }
    vocab_size = 16
    B, L = 2, 8                                   # batch, window-padded length
    W = 2 * hyperparameters["window_size"] + 1
    Lp = L - W + 1

    model = WordWindowClassifierPallas(hyperparameters, vocab_size,
                                       pad_ix=0, key=k_param)
    inputs = jax.random.randint(k_in, (B, L), 0, vocab_size, dtype=jnp.int32)

    out = model(inputs)
    out = jax.block_until_ready(out)

    ref = _reference_forward(model, inputs)
    assert out.shape == (B, Lp), out.shape
    assert np.allclose(np.asarray(out), np.asarray(ref), atol=1e-4, rtol=1e-4), (
        float(np.max(np.abs(np.asarray(out) - np.asarray(ref)))))

    print("KERNEL_OK")
</pallas_src>

<mosaic_0001>
module attributes {stable_mosaic.version = 11 : i64} {
  func.func @_word_window_kernel(%arg0: i32, %arg1: memref<1x8x32xbf16, #tpu.memory_space<vmem>>, %arg2: memref<5x32x128xbf16, #tpu.memory_space<vmem>>, %arg3: memref<1x128xf32, #tpu.memory_space<vmem>>, %arg4: memref<1x128xf32, #tpu.memory_space<vmem>>, %arg5: memref<1x1xf32, #tpu.memory_space<vmem>>, %arg6: memref<1x4x1xf32, #tpu.memory_space<vmem>>) attributes {dimension_semantics = [#tpu.dimension_semantics<parallel>], iteration_bounds = array<i64: 2>, scalar_prefetch = 0 : i64, scratch_operands = 0 : i64, tpu.core_type = #tpu.core_type<tc>, window_params = [{transform_indices = @transform_0, window_bounds = array<i64: 1, 8, 32>}, {pipeline_mode = #tpu.pipeline_mode<synchronous>, transform_indices = @transform_1, window_bounds = array<i64: 5, 32, 128>}, {pipeline_mode = #tpu.pipeline_mode<synchronous>, transform_indices = @transform_2, window_bounds = array<i64: 1, 128>}, {pipeline_mode = #tpu.pipeline_mode<synchronous>, transform_indices = @transform_3, window_bounds = array<i64: 1, 128>}, {pipeline_mode = #tpu.pipeline_mode<synchronous>, transform_indices = @transform_4, window_bounds = array<i64: 1, 1>}, {transform_indices = @transform_5, window_bounds = array<i64: 1, 4, 1>}]} {
    %cst = arith.constant 0.000000e+00 : f32
    %0 = vector.broadcast %cst : f32 to vector<4x128xf32>
    %c0 = arith.constant 0 : index
    %c0_0 = arith.constant 0 : index
    %c0_1 = arith.constant 0 : index
    %1 = vector.load %arg1[%c0, %c0_0, %c0_1] : memref<1x8x32xbf16, #tpu.memory_space<vmem>>, vector<1x4x32xbf16>
    %2 = vector.shape_cast %1 : vector<1x4x32xbf16> to vector<4x32xbf16>
    %c0_2 = arith.constant 0 : index
    %c0_3 = arith.constant 0 : index
    %c0_4 = arith.constant 0 : index
    %3 = vector.load %arg2[%c0_2, %c0_3, %c0_4] : memref<5x32x128xbf16, #tpu.memory_space<vmem>>, vector<1x32x128xbf16>
    %4 = vector.shape_cast %3 : vector<1x32x128xbf16> to vector<32x128xbf16>
    %cst_5 = arith.constant dense<0.000000e+00> : vector<4x128xf32>
    %5 = tpu.matmul %2, %4, %cst_5 {dimension_numbers = #tpu.dot_dimension_numbers<[1], [0], [0], [1], [0, 0, 1, 1], [], []>} : vector<4x32xbf16>, vector<32x128xbf16>, vector<4x128xf32> -> vector<4x128xf32>
    %6 = arith.addf %0, %5 : vector<4x128xf32>
    %c0_6 = arith.constant 0 : index
    %c1 = arith.constant 1 : index
    %c0_7 = arith.constant 0 : index
    %7 = vector.load %arg1[%c0_6, %c1, %c0_7] : memref<1x8x32xbf16, #tpu.memory_space<vmem>>, vector<1x4x32xbf16>
    %8 = vector.shape_cast %7 : vector<1x4x32xbf16> to vector<4x32xbf16>
    %c1_8 = arith.constant 1 : index
    %c0_9 = arith.constant 0 : index
    %c0_10 = arith.constant 0 : index
    %9 = vector.load %arg2[%c1_8, %c0_9, %c0_10] : memref<5x32x128xbf16, #tpu.memory_space<vmem>>, vector<1x32x128xbf16>
    %10 = vector.shape_cast %9 : vector<1x32x128xbf16> to vector<32x128xbf16>
    %cst_11 = arith.constant dense<0.000000e+00> : vector<4x128xf32>
    %11 = tpu.matmul %8, %10, %cst_11 {dimension_numbers = #tpu.dot_dimension_numbers<[1], [0], [0], [1], [0, 0, 1, 1], [], []>} : vector<4x32xbf16>, vector<32x128xbf16>, vector<4x128xf32> -> vector<4x128xf32>
    %12 = arith.addf %6, %11 : vector<4x128xf32>
    %c0_12 = arith.constant 0 : index
    %c2 = arith.constant 2 : index
    %c0_13 = arith.constant 0 : index
    %13 = vector.load %arg1[%c0_12, %c2, %c0_13] : memref<1x8x32xbf16, #tpu.memory_space<vmem>>, vector<1x4x32xbf16>
    %14 = vector.shape_cast %13 : vector<1x4x32xbf16> to vector<4x32xbf16>
    %c2_14 = arith.constant 2 : index
    %c0_15 = arith.constant 0 : index
    %c0_16 = arith.constant 0 : index
    %15 = vector.load %arg2[%c2_14, %c0_15, %c0_16] : memref<5x32x128xbf16, #tpu.memory_space<vmem>>, vector<1x32x128xbf16>
    %16 = vector.shape_cast %15 : vector<1x32x128xbf16> to vector<32x128xbf16>
    %cst_17 = arith.constant dense<0.000000e+00> : vector<4x128xf32>
    %17 = tpu.matmul %14, %16, %cst_17 {dimension_numbers = #tpu.dot_dimension_numbers<[1], [0], [0], [1], [0, 0, 1, 1], [], []>} : vector<4x32xbf16>, vector<32x128xbf16>, vector<4x128xf32> -> vector<4x128xf32>
    %18 = arith.addf %12, %17 : vector<4x128xf32>
    %c0_18 = arith.constant 0 : index
    %c3 = arith.constant 3 : index
    %c0_19 = arith.constant 0 : index
    %19 = vector.load %arg1[%c0_18, %c3, %c0_19] : memref<1x8x32xbf16, #tpu.memory_space<vmem>>, vector<1x4x32xbf16>
    %20 = vector.shape_cast %19 : vector<1x4x32xbf16> to vector<4x32xbf16>
    %c3_20 = arith.constant 3 : index
    %c0_21 = arith.constant 0 : index
    %c0_22 = arith.constant 0 : index
    %21 = vector.load %arg2[%c3_20, %c0_21, %c0_22] : memref<5x32x128xbf16, #tpu.memory_space<vmem>>, vector<1x32x128xbf16>
    %22 = vector.shape_cast %21 : vector<1x32x128xbf16> to vector<32x128xbf16>
    %cst_23 = arith.constant dense<0.000000e+00> : vector<4x128xf32>
    %23 = tpu.matmul %20, %22, %cst_23 {dimension_numbers = #tpu.dot_dimension_numbers<[1], [0], [0], [1], [0, 0, 1, 1], [], []>} : vector<4x32xbf16>, vector<32x128xbf16>, vector<4x128xf32> -> vector<4x128xf32>
    %24 = arith.addf %18, %23 : vector<4x128xf32>
    %c0_24 = arith.constant 0 : index
    %c4 = arith.constant 4 : index
    %c0_25 = arith.constant 0 : index
    %25 = vector.load %arg1[%c0_24, %c4, %c0_25] : memref<1x8x32xbf16, #tpu.memory_space<vmem>>, vector<1x4x32xbf16>
    %26 = vector.shape_cast %25 : vector<1x4x32xbf16> to vector<4x32xbf16>
    %c4_26 = arith.constant 4 : index
    %c0_27 = arith.constant 0 : index
    %c0_28 = arith.constant 0 : index
    %27 = vector.load %arg2[%c4_26, %c0_27, %c0_28] : memref<5x32x128xbf16, #tpu.memory_space<vmem>>, vector<1x32x128xbf16>
    %28 = vector.shape_cast %27 : vector<1x32x128xbf16> to vector<32x128xbf16>
    %cst_29 = arith.constant dense<0.000000e+00> : vector<4x128xf32>
    %29 = tpu.matmul %26, %28, %cst_29 {dimension_numbers = #tpu.dot_dimension_numbers<[1], [0], [0], [1], [0, 0, 1, 1], [], []>} : vector<4x32xbf16>, vector<32x128xbf16>, vector<4x128xf32> -> vector<4x128xf32>
    %30 = arith.addf %24, %29 : vector<4x128xf32>
    %c0_30 = arith.constant 0 : index
    %c0_31 = arith.constant 0 : index
    %31 = vector.load %arg3[%c0_30, %c0_31] : memref<1x128xf32, #tpu.memory_space<vmem>>, vector<1x128xf32>
    %32 = vector.broadcast %31 : vector<1x128xf32> to vector<4x128xf32>
    %33 = arith.addf %30, %32 : vector<4x128xf32>
    %34 = math.tanh %33 : vector<4x128xf32>
    %c0_32 = arith.constant 0 : index
    %c0_33 = arith.constant 0 : index
    %35 = vector.load %arg4[%c0_32, %c0_33] : memref<1x128xf32, #tpu.memory_space<vmem>>, vector<1x128xf32>
    %36 = vector.broadcast %35 : vector<1x128xf32> to vector<4x128xf32>
    %37 = arith.mulf %34, %36 : vector<4x128xf32>
    %cst_34 = arith.constant dense<0.000000e+00> : vector<4xf32>
    %38 = vector.multi_reduction <add>, %37, %cst_34 [1] : vector<4x128xf32> to vector<4xf32>
    %39 = vector.shape_cast %38 : vector<4xf32> to vector<4x1xf32>
    %c0_35 = arith.constant 0 : index
    %c0_36 = arith.constant 0 : index
    %40 = vector.load %arg5[%c0_35, %c0_36] : memref<1x1xf32, #tpu.memory_space<vmem>>, vector<1x1xf32>
    %41 = vector.broadcast %40 : vector<1x1xf32> to vector<4x1xf32>
    %42 = arith.addf %39, %41 : vector<4x1xf32>
    %43 = arith.negf %42 : vector<4x1xf32>
    %44 = math.exp %43 : vector<4x1xf32>
    %cst_37 = arith.constant 1.000000e+00 : f32
    %45 = vector.broadcast %cst_37 : f32 to vector<4x1xf32>
    %46 = arith.addf %45, %44 : vector<4x1xf32>
    %47 = arith.divf %45, %46 : vector<4x1xf32>
    %c0_38 = arith.constant 0 : index
    %c0_39 = arith.constant 0 : index
    %c0_40 = arith.constant 0 : index
    %48 = vector.load %arg6[%c0_38, %c0_39, %c0_40] : memref<1x4x1xf32, #tpu.memory_space<vmem>>, vector<1x4x1xf32>
    %49 = vector.shape_cast %48 : vector<1x4x1xf32> to vector<4x1xf32>
    %50 = vector.shape_cast %47 : vector<4x1xf32> to vector<1x4x1xf32>
    tpu.vector_store %arg6[%c0_38, %c0_39, %c0_40], %50 {strides = array<i32>} : memref<1x4x1xf32, #tpu.memory_space<vmem>>, vector<1x4x1xf32>,
    return
  }
  func.func @transform_0(%arg0: i32) -> (i32, i32, i32) {
    %c0_i32 = arith.constant 0 : i32
    %c0_i32_0 = arith.constant 0 : i32
    %c0_i32_1 = arith.constant 0 : i32
    return %arg0, %c0_i32, %c0_i32_0 : i32, i32, i32
  }
  func.func @transform_1(%arg0: i32) -> (i32, i32, i32) {
    %c0_i32 = arith.constant 0 : i32
    %c0_i32_0 = arith.constant 0 : i32
    %c0_i32_1 = arith.constant 0 : i32
    %c0_i32_2 = arith.constant 0 : i32
    return %c0_i32, %c0_i32_0, %c0_i32_1 : i32, i32, i32
  }
  func.func @transform_2(%arg0: i32) -> (i32, i32) {
    %c0_i32 = arith.constant 0 : i32
    %c0_i32_0 = arith.constant 0 : i32
    %c0_i32_1 = arith.constant 0 : i32
    return %c0_i32, %c0_i32_0 : i32, i32
  }
  func.func @transform_3(%arg0: i32) -> (i32, i32) {
    %c0_i32 = arith.constant 0 : i32
    %c0_i32_0 = arith.constant 0 : i32
    %c0_i32_1 = arith.constant 0 : i32
    return %c0_i32, %c0_i32_0 : i32, i32
  }
  func.func @transform_4(%arg0: i32) -> (i32, i32) {
    %c0_i32 = arith.constant 0 : i32
    %c0_i32_0 = arith.constant 0 : i32
    %c0_i32_1 = arith.constant 0 : i32
    return %c0_i32, %c0_i32_0 : i32, i32
  }
  func.func @transform_5(%arg0: i32) -> (i32, i32, i32) {
    %c0_i32 = arith.constant 0 : i32
    %c0_i32_0 = arith.constant 0 : i32
    %c0_i32_1 = arith.constant 0 : i32
    return %arg0, %c0_i32, %c0_i32_0 : i32, i32, i32
  }
}

</mosaic_0001>

<bundles_post_ra>
// kernel: tpu_custom_call.1
= control target key start
LH: loop header
LB: loop body
LE: loop exit
PB: predicated region body
PF: predicated region fallthrough
CT: control target
= control target key end

     0   :  { %s1170_s0 = inlined_call_operand.hbm [shape: bf16[2,8,32], index: 0, kind: input, shape index: {}]   ;;  %s1171_s1 = inlined_call_operand.hbm [shape: bf16[5,32,128], index: 1, kind: input, shape index: {}]   ;;  %s1172_s2 = inlined_call_operand.vmem [shape: f32[1,128], index: 2, kind: input, shape index: {}]   ;;  %s1173_s3 = inlined_call_operand.vmem [shape: f32[1,128], index: 3, kind: input, shape index: {}]   ;;  %s1174_s4 = inlined_call_operand.<no memory space> [shape: f32[1,1], index: 4, kind: input, shape index: {}]   ;;  %s1175_s5 = inlined_call_operand.vmem [shape: f32[2,4,1], index: 5, kind: output, shape index: {}]  }
   0x1   :  { %v10_v0 = vstv %s1174_s4 }
   0x2   :  { %11 = vst [vmem:[#allocation2] sm:$0x1] %v10_v0 }
   0x3   :  { %12 = vsyncpa [#allocation4], 0 }
   0x4   :  { %14 = vsyncpa [#allocation4 + $0x1], 0 }
   0x5   :  { %15 = vsyncpa [#allocation6], 0  ;;  %s1008_s20 = smov 0   ;;  %s1010_s21 = smov 0  }
   0x6   :  { %s1012_s22 = smov 0   ;;  %s1014_s23 = smov 0  }
   0x7 LB: > { %s1027_s4 = sadd.s32 4294967295, %s967_s23   ;;  %p41_p0 = scmp.ne.s32.totalorder %s959_s21, %s955_s20  ;;  %s967_s23 = sphi %s1014_s23, %s1190_s23   ;;  %s963_s22 = sphi %s1012_s22, %s1189_s22   ;;  %s959_s21 = sphi %s1010_s21, %s1188_s21   ;;  %s955_s20 = sphi %s1008_s20, %s1187_s20  }
   0x8   : > { %p1176_p1 = scmp.eq.s32.totalorder %s1027_s4, 0  ;;  %p708_p2 = scmp.ge.s32.totalorder %s967_s23, 1 }
   0x9   : > { %p162_p3 = scmp.lt.s32.totalorder %s967_s23, 3  ;;  %s969_s26 = smov [#allocation5]  }
   0xa   : > { %p1035_p4 = por %p1176_p1, %p41_p0  ;;  %s174_s27 = sshll.u32 %s969_s26, 4  ;;  %s175_s27 = int_to_ptr.vmem [resolvable:$true] %s174_s27 }
   0xb   : > { %p1039_p5 = pnand %p708_p2, %p162_p3  ;;  %s1052_s29 = sadd.s32 1, %s967_s23  }
   0xc   : > { %s1179_s24 = scalar_select %p1035_p4, 1, 0 }
   0xd   : > { %s1180_s25 = scalar_select %p1039_p5, 1, 0 }
   0xe   : > { %p803_p6 = pneg %p1039_p5  ;;  %s28_s30 = sadd.s32 1, %s963_s22 }
   0xf   : > { %s25_s6 = ssub.s32 %s967_s23, %s1052_s29  ;;  %s871_s9 = scalar_lea.hbm %s1171_s1, 1280 }
  0x10   : > { %p1047_p7 = pnand %p803_p6, %p1176_p1  ;;  %p872_p8 = scmp.ne.s32.totalorder %s1171_s1, %s871_s9 }
  0x11   : > { %p878_p12 = scmp.lt.u32.totalorder %s871_s9, %s1171_s1 }
  0x12   : > { %p873_p9 = pneg %p1047_p7 }
  0x14   : > { %p874_p10 = pnand %p873_p9, %p872_p8 }
  0x16   : > { %p875_p11 = pneg %p874_p10 }
  0x18   : > { %p880_p13 = pnand %p878_p12, %p875_p11 }
  0x1a   : > { %883 = shalt.err (!%p880_p13)
}
  0x1b   : > { %s884_s14 = scalar_lea.vmem %s175_s27, 1280  ;;  %p892_p6 = scmp.lt.s32.totalorder %s175_s27, %s175_s27 }
  0x1c   : > { %p885_p0 = scmp.ne.s32.totalorder %s175_s27, %s884_s14  ;;  %p893_p1 = scmp.lt.s32.totalorder %s884_s14, %s884_s14 }
  0x1e   : > { %p887_p2 = pnand %p885_p0, %p873_p9  ;;  %p894_p4 = por %p893_p1, %p892_p6 }
  0x20   : > { %p888_p3 = pneg %p887_p2 }
  0x22   : > { %p895_p5 = pnand %p894_p4, %p888_p3 }
  0x24   : > { %898 = shalt.err (!%p895_p5)
}
  0x25   : > { %s970_s15 = smov 64   ;;  %s971_s16 = smov 4  }
  0x26   : > { %806 = dma.hbm_to_vmem [thread:$0]  (!%p1047_p7), %s1171_s1, 1280, %s175_s27, [#allocation6], %s970_s15, %s970_s15, %s971_s16  }
  0x27   : > { %p26_p8 = scmp.eq.s32.totalorder %s25_s6, 0  ;;  %p35_p9 = scmp.ne.s32.totalorder %s963_s22, %s959_s21 }
  0x28   : > { %p36_p1 = scmp.eq.s32.totalorder %s967_s23, 0  ;;  %p812_p4 = scmp.lt.s32.totalorder %s967_s23, 2 }
  0x29   : > { %s1078_s19 = scalar_select %p26_p8, %s963_s22, %s28_s30  }
  0x2a   : > { %p37_p5 = por %p36_p1, %p35_p9  ;;  %s197_s20 = sand.u32 1, %s963_s22  }
  0x2b   : > { %s711_s26 = sshll.u32 %s197_s20, 2  ;;  %s712_s7 = sshll.u32 %s967_s23, 6 }
  0x2c   : > { %s1085_s10 = scalar_lea.hbm %s1170_s0, %s712_s7  ;;  %s201_s27 = scalar_lea.vmem [#allocation3], %s711_s26 }
  0x2d   : > { %s208_s28 = sshll.u32 %s201_s27, 4  ;;  %p1089_p7 = pnand %p812_p4, %p37_p5  ;;  %s1087_s28 = int_to_ptr.vmem [resolvable:$true] %s208_s28 }
  0x2e   : > { %s198_s23 = scalar_lea.sflag [#allocation4], %s197_s20  ;;  %s899_s6 = scalar_lea.hbm %s1085_s10, 64 }
  0x2f   : > { %p900_p10 = scmp.ne.s32.totalorder %s1085_s10, %s899_s6  ;;  %p901_p11 = pneg %p1089_p7 }
  0x30   : > { %s904_s13 = scalar_lea.hbm %s1170_s0, 128  ;;  %p905_p0 = scmp.lt.u32.totalorder %s1085_s10, %s1170_s0 }
  0x31   : > { %p902_p12 = pnand %p901_p11, %p900_p10  ;;  %p906_p2 = scmp.lt.u32.totalorder %s904_s13, %s899_s6 }
  0x32   : > { %p908_p6 = scmp.lt.u32.totalorder %s899_s6, %s1085_s10 }
  0x33   : > { %p903_p13 = pneg %p902_p12  ;;  %p907_p3 = por %p906_p2, %p905_p0 }
  0x35   : > { %p909_p8 = por %p908_p6, %p907_p3 }
  0x37   : > { %p910_p9 = pnand %p909_p8, %p903_p13 }
  0x39   : > { %913 = shalt.err (!%p910_p9)
}
  0x3a   : > { %s914_s16 = scalar_lea.vmem %s1087_s28, 64  ;;  %s972_s17 = smov [#allocation3]  }
  0x3b   : > { %p915_p1 = scmp.ne.s32.totalorder %s1087_s28, %s914_s16  ;;  %s919_s18 = sshll.u32 %s972_s17, 4  ;;  %s920_s18 = int_to_ptr.vmem [resolvable:$false] %s919_s18 }
  0x3c   : > { %s921_s20 = scalar_lea.vmem %s920_s18, 128  ;;  %p922_p10 = scmp.lt.s32.totalorder %s1087_s28, %s920_s18 }
  0x3d   : > { %p917_p4 = pnand %p915_p1, %p901_p11  ;;  %p923_p12 = scmp.lt.s32.totalorder %s921_s20, %s914_s16 }
  0x3f   : > { %p918_p5 = pneg %p917_p4  ;;  %p924_p0 = por %p923_p12, %p922_p10 }
  0x41   : > { %p925_p2 = pnand %p924_p0, %p918_p5 }
  0x43   : > { %928 = shalt.err (!%p925_p2)
}
  0x44   : > { %810 = dma.hbm_to_vmem [thread:$0]  (!%p1089_p7), %s1085_s10, 64, %s1087_s28, %s198_s23  }
  0x45   : > { %p1183_p13 = scmp.ne.s32.totalorder %s1180_s25, 0 }
  0x46   : > { %s219_s26 = sand.u32 (!%p1183_p13), 1, %s959_s21   ;;  %p1184_p11 = scmp.ne.s32.totalorder (!%p1183_p13), %s1179_s24, 0 }
  0x47   : > { %217 = sbr.rel (%p1183_p13) target bundleno = 510 (0x1fe), region = 40  ;;  %s714_s7 = sshll.u32 (!%p1183_p13), %s219_s26, 2 }
  0x48   : > { %s220_s8 = scalar_lea.sflag (!%p1183_p13), [#allocation4], %s219_s26  ;;  %s1121_s9 = scalar_lea.vmem (!%p1183_p13), [#allocation3], %s714_s7 }
  0x4e   : > { %946 = dma.done.wait (%p1184_p11), %s220_s8, 64  }
  0x4f   : > { %948 = vsyncadd (%p1184_p11), %s220_s8, 4294967232  ;;  %p1185_p3 = scmp.eq.s32.totalorder %s1027_s4, 0 }
  0x51   : > { %950 = dma.done.wait (%p1185_p3), [#allocation6], 1280   ;;  %p1186_p7 = pmov %p1185_p3 }
  0x52   : > { %v973_v1 = vmov 0.0   ;;  %vm974_vm0 = vmmov 0   ;;  %v851_v2 = vld [vmem:[#allocation5 + $0x10] sm:$0xff]   ;;  %v852_v3 = vld [vmem:[#allocation5] sm:$0xff]   ;;  %v853_v4 = vld [vmem:[#allocation5 + $0x18] sm:$0xff]   ;;  %vm291_vm1 = vcmask 261120  }
  0x53   : > { %952 = vsyncadd (%p1186_p7), [#allocation6], 4294966016  ;;  %757 = vmatprep.subr.bf16.mxu0 %v973_v1  ;;  %765 = vmatprep.subr.bf16.mxu1 %v973_v1  ;;  %v854_v5 = vld [vmem:[#allocation5 + $0x8] sm:$0xff]   ;;  %v855_v6 = vld [vmem:[%s1121_s9] ss:$0 sps:$4 sm:$0x77]  }
  0x54   : > { %761 = vmatprep.mubr.msk.bf16.mxu0 %vm974_vm0, %v973_v1  ;;  %769 = vmatprep.mubr.msk.bf16.mxu1 %vm974_vm0, %v973_v1  ;;  %v258_v7 = vld [vmem:[%s1121_s9] sm:$0x3]  ;;  %v273_v8 = vshrl.u32 %v855_v6, 16  ;;  %v275_v9 = vshll.u32 %v855_v6, 16  ;;  %v857_v10 = vld [vmem:[#allocation5 + $0x30] sm:$0xff]   ;;  %v856_v12 = vld [vmem:[#allocation5 + $0x20] sm:$0xff]  }
  0x55   : > { %758 = vmatpush3.bf16.msra.mxu0 %v851_v2  ;;  %766 = vmatpush3.bf16.msra.mxu1 %v852_v3  ;;  %v860_v14 = vld [vmem:[%s1121_s9] ss:$0 sps:$4 sm:$0x66]   ;;  %v858_v17 = vld [vmem:[#allocation5 + $0x28] sm:$0xff]   ;;  %v861_v23 = vld [vmem:[#allocation5 + $0x40] sm:$0xff]   ;;  %vm612_vm2 = vcmask 1043456  }
  0x56   : > { %759 = vmatprep.subr.bf16.mxu0 %v973_v1  ;;  %767 = vmatprep.subr.bf16.mxu1 %v973_v1  ;;  %v277_v11 = vrot.slane %v275_v9, 1  ;;  %v859_v15 = vld [vmem:[#allocation5 + $0x38] sm:$0xff]   ;;  %v399_v22 = vrot.slane %v860_v14, 1  ;;  %v863_v26 = vld [vmem:[#allocation5 + $0x48] sm:$0xff]   ;;  %v736_v48 = vld [vmem:[%s1172_s2] ss:$0 sm:$0xff] }
  0x57   : > { %v862_v16 = vld [vmem:[%s1121_s9] ss:$0 sps:$4 sm:$0xee]   ;;  %v737_v54 = vld [vmem:[%s1173_s3] ss:$0 sm:$0xff]  ;;  %p253_p6 = scmp.lt.s32.totalorder %s1027_s4, 1 }
  0x58   : > { %v278_v13 = vor.u32 %v277_v11, %v273_v8  ;;  %v466_v18 = vshrl.u32 %v862_v16, 16  ;;  %v469_v19 = vshll.u32 %v862_v16, 16  ;;  %v864_v25 = vld [vmem:[%s1121_s9] ss:$0 sps:$4 sm:$0xcc]   ;;  %vm630_vm3 = vcmask 3072  }
  0x59   : > { %760 = vmatpush3.bf16.msra.mxu0 %v853_v4  ;;  %768 = vmatpush3.bf16.msra.mxu1 %v854_v5  ;;  %v538_v27 = vrot.slane %v864_v25, 2  ;;  %v738_v58 = vld [vmem:[#allocation2] ss:$0 sm:$0xff]  ;;  %s1192_s4 = smov (!%p253_p6, %s1027_s4), 1 }
  0x5a   : > { %773 = vmatprep.subr.bf16.mxu0 %v973_v1  ;;  %781 = vmatprep.subr.bf16.mxu1 %v973_v1  ;;  %v468_v20 = vrot.slane %v466_v18, 1  ;;  %v471_v21 = vrot.slane %v469_v19, 2  ;;  %s716_s28 = sshll.u32 %s1192_s4, 2 }
  0x5b   : > { %s256_s6 = scalar_lea.vmem %s1175_s5, %s716_s28 }
  0x5c   : > { %770 = vmatmul.mubr.msk.bf16.vlgmr.msra.gmra.mrb[0].mxu1 %vm291_vm1, %v258_v7  ;;  %762 = vmatmul.mubr.msk.bf16.vlgmr.msra.gmra.mrb[0].mxu0 %vm291_vm1, %v278_v13  ;;  %v472_v24 = vor.u32 %v471_v21, %v468_v20 }
  0x5d   : > { %782 = vmatpush3.bf16.msra.mxu1 %v857_v10  ;;  %785 = vmatprep.mubr.msk.bf16.mxu1 %vm974_vm0, %v973_v1 }
  0x5e   : > { %783 = vmatprep.subr.bf16.mxu1 %v973_v1  ;;  %774 = vmatpush3.bf16.msra.mxu0 %v856_v12 }
  0x5f   : > { %777 = vmatprep.mubr.msk.bf16.mxu0 %vm974_vm0, %v973_v1  ;;  %775 = vmatprep.subr.bf16.mxu0 %v973_v1 }
  0x61   : > { %784 = vmatpush3.bf16.msra.mxu1 %v859_v15 }
  0x62   : > { %776 = vmatpush3.bf16.msra.mxu0 %v858_v17 }
  0x63   : > { %789 = vmatprep.subr.bf16.mxu0 %v973_v1 }
  0x64   : > { %786 = vmatmul.mubr.msk.bf16.vlgmr.msra.gmra.mrb[4].mxu1 %vm291_vm1, %v472_v24 }
  0x65   : > { %778 = vmatmul.mubr.msk.bf16.vlgmr.msra.gmra.mrb[4].mxu0 %vm291_vm1, %v399_v22 }
  0x66   : > { %790 = vmatpush3.bf16.msra.mxu0 %v861_v23  ;;  %793 = vmatprep.mubr.msk.bf16.mxu0 %vm974_vm0, %v973_v1 }
  0x67   : > { %791 = vmatprep.subr.bf16.mxu0 %v973_v1 }
  0x6a   : > { %792 = vmatpush3.bf16.msra.mxu0 %v863_v26 }
  0x6d   : > { %794 = vmatmul.mubr.msk.bf16.vlgmr.msra.gmra.mrb[8].mxu0 %vm291_vm1, %v538_v27 }
 0x12f   : > { %v384_v28 = vpop.f32.mrb[0].mxu1  ;;  %v329_v30 = vpop.f32.mrb[0].mxu0 }
 0x130   : > { %v771_v29 = vpop.f32.mrb[1].mxu1  ;;  %v763_v32 = vpop.f32.mrb[1].mxu0  ;;  %v385_v33 = vadd.f32 %v384_v28, %v329_v30 }
 0x131   : > { %v387_v31 = vpop.f32.mrb[2].mxu1  ;;  %v332_v35 = vpop.f32.mrb[2].mxu0 }
 0x132   : > { %v772_v34 = vpop.f32.mrb[3].mxu1  ;;  %v764_v36 = vpop.f32.mrb[3].mxu0 }
 0x137   : > { %v522_v37 = vpop.f32.mrb[4].mxu1 }
 0x138   : > { %v449_v38 = vpop.f32.mrb[4].mxu0  ;;  %v787_v39 = vpop.f32.mrb[5].mxu1 }
 0x139   : > { %v455_v40 = vadd.f32 %v449_v38, %v385_v33  ;;  %v779_v41 = vpop.f32.mrb[5].mxu0  ;;  %v525_v42 = vpop.f32.mrb[6].mxu1 }
 0x13a   : > { %v452_v43 = vpop.f32.mrb[6].mxu0  ;;  %v788_v44 = vpop.f32.mrb[7].mxu1 }
 0x13b   : > { %v528_v45 = vadd.f32 %v522_v37, %v455_v40  ;;  %v780_v46 = vpop.f32.mrb[7].mxu0 }
 0x140   : > { %v588_v47 = vpop.f32.mrb[8].mxu0 }
 0x141   : > { %v594_v49 = vadd.f32 %v588_v47, %v528_v45  ;;  %v795_v50 = vpop.f32.mrb[9].mxu0 }
 0x142   : > { %v591_v51 = vpop.f32.mrb[10].mxu0 }
 0x143   : > { %v602_v52 = vadd.f32 %v736_v48, %v594_v49  ;;  %v796_v53 = vpop.f32.mrb[11].mxu0 }
 0x145   : > { %865 = vtanh.f32 %v602_v52 }
 0x14f   : > { %v866_v55 = vpop.eup %865 }
 0x150   : > { %v611_v56 = vmul.f32 %v866_v55, %v737_v54 }
 0x152   : > { %v613_v57 = vsel %vm612_vm2, %v611_v56, 0.0 }
 0x153   : > { %614 = vadd.xlane.f32.xlu0 %v613_v57 }
 0x1e0   : > { %v615_v59 = vpop.xlane.xlu0 %614 }
 0x1e1   : > { %v623_v60 = vadd.f32 %v738_v58, %v615_v59 }
 0x1e3   : > { %v739_v61 = vmul.f32 -1.442695, %v623_v60 }
 0x1e5   : > { %867 = vpow2.f32 %v739_v61 }
 0x1ef   : > { %v868_v62 = vpop.eup %867 }
 0x1f0   : > { %v627_v63 = vadd.f32 1.0, %v868_v62 }
 0x1f2   : > { %869 = vrcp.f32 %v627_v63 }
 0x1fc   : > { %v870_v0 = vpop.eup %869 }
 0x1fd   : > { %631 = vst.msk [vmem:[%s256_s6] sm:$0xf] %vm630_vm3, %v870_v0 }
 0x1fe PF: > { %p18_p8 = scmp.ge.s32.totalorder %s1052_s29, 4   ;;  %s1187_s20 = smov %s959_s21 }
 0x1ff   : > { %s1188_s21 = smov %s963_s22  ;;  %s1189_s22 = smov %s1078_s19 }
 0x200   : > { %s1190_s23 = smov %s1052_s29  ;;  %20 = sbr.rel (!%p18_p8) target bundleno = 7 (0x7), region = 88 }
 0x207   :  { %651 = vsyncpa [#allocation4], 1 }
 0x208   :  { %653 = vsyncpa [#allocation4 + $0x1], 1 }
 0x209   :  { %654 = vsyncpa [#allocation6], 1 }

</bundles_post_ra>
